<compile_context>
chip_gen: v7x
topology: tpu7x:2x2x1
jax: 0.10.0
libtpu: 0.0.40
codegen_flags: <defaults>
</compile_context>

<pallas_src>
import functools

import jax
import jax.numpy as jnp
from jax.experimental import pallas as pl
from jax.experimental.pallas import tpu as pltpu


def _ce_kernel(label_ref, pred_ref, out_ref, m_ref, l_ref, p_ref, *, tile_c):
    """Per-row cross-entropy with online (flash-style) logsumexp over the
    class axis (grid axis 1)."""
    j = pl.program_id(1)

    @pl.when(j == 0)
    def _():
        m_ref[...] = jnp.full_like(m_ref, -jnp.inf)   # running max
        l_ref[...] = jnp.zeros_like(l_ref)            # running sum-exp
        p_ref[...] = jnp.zeros_like(p_ref)            # picked (true-class) logit

    logits = pred_ref[...].astype(jnp.float32)        # (tile_n, tile_c)
    labels = label_ref[...]                           # (tile_n, 1) int32

    # Gather logits[row, label[row]] via one-hot mask (no dynamic gather on TPU).
    col = jax.lax.broadcasted_iota(jnp.int32, logits.shape, 1) + j * tile_c
    p_ref[...] += jnp.sum(jnp.where(col == labels, logits, 0.0),
                          axis=-1, keepdims=True)

    # Online logsumexp update.
    m_prev = m_ref[...]
    m_new = jnp.maximum(m_prev, jnp.max(logits, axis=-1, keepdims=True))
    l_ref[...] = (l_ref[...] * jnp.exp(m_prev - m_new)
                  + jnp.sum(jnp.exp(logits - m_new), axis=-1, keepdims=True))
    m_ref[...] = m_new

    @pl.when(j == pl.num_programs(1) - 1)
    def _():
        # loss_row = logsumexp(row) - logits[row, label[row]]
        out_ref[...] = m_ref[...] + jnp.log(l_ref[...]) - p_ref[...]


def _round_up(x, m):
    return ((x + m - 1) // m) * m


def _vmem_capacity_bytes():
    try:
        return int(pltpu.get_tpu_info().vmem_capacity_bytes)
    except Exception:
        return 64 * 1024 * 1024  # conservative (v7x-sized) fallback


def classifier_cross_entropy_loss(pred, label, *, max_tile_c=2048,
                                  max_tile_n=1024):
    """pred: [N, C] float32/bfloat16 logits; label: [N] int class indices.
    Returns scalar mean cross-entropy (same semantics as nn.CrossEntropyLoss())."""
    N, C = pred.shape
    label2d = label.astype(jnp.int32).reshape(N, 1)

    itemsize = jnp.dtype(pred.dtype).itemsize
    row_align = 16 if itemsize == 2 else 8  # bf16 needs (16,128) min sublane tile

    # --- class-axis tiling (only engaged for large C) ----------------------
    if C <= max_tile_c:
        tile_c, c_pad = C, C
    else:
        tile_c = max_tile_c                    # multiple of 128
        c_pad = _round_up(C, tile_c)

    # --- VMEM-budgeted row tile (generation aware) -------------------------
    vmem_cap = _vmem_capacity_bytes()
    vmem_limit = vmem_cap // 2                 # scoped limit we request
    budget = (vmem_limit * 3) // 4             # headroom for internal scratch
    # per-row VMEM bytes: double-buffered logits + lane-padded label/out blocks
    # (2+2 buffers) + three (tile_n,1) f32 scratches, all padded to 128 lanes.
    per_row = 2 * tile_c * itemsize + 7 * 128 * 4
    tile_n = min(max_tile_n, budget // per_row)
    tile_n = (tile_n // row_align) * row_align
    tile_n = max(tile_n, row_align)
    tile_n = min(tile_n, _round_up(N, row_align))   # small-N -> single block

    n_pad = _round_up(N, tile_n)

    # --- wrapper-side padding (rows with 0, classes with dtype-min) --------
    if c_pad != C:
        pred = jnp.pad(pred, ((0, 0), (0, c_pad - C)),
                       constant_values=jnp.finfo(pred.dtype).min)
    if n_pad != N:
        pred = jnp.pad(pred, ((0, n_pad - N), (0, 0)))
        label2d = jnp.pad(label2d, ((0, n_pad - N), (0, 0)))

    grid = (n_pad // tile_n, c_pad // tile_c)
    kernel = functools.partial(_ce_kernel, tile_c=tile_c)

    losses = pl.pallas_call(
        kernel,
        out_shape=jax.ShapeDtypeStruct((n_pad, 1), jnp.float32),
        grid_spec=pltpu.PrefetchScalarGridSpec(
            num_scalar_prefetch=0,
            grid=grid,
            in_specs=[
                pl.BlockSpec((tile_n, 1), lambda i, j: (i, 0)),       # labels
                pl.BlockSpec((tile_n, tile_c), lambda i, j: (i, j)),  # logits
            ],
            out_specs=pl.BlockSpec((tile_n, 1), lambda i, j: (i, 0)),
            scratch_shapes=[pltpu.VMEM((tile_n, 1), jnp.float32)] * 3,
        ),
        compiler_params=pltpu.CompilerParams(
            dimension_semantics=("parallel", "arbitrary"),
            vmem_limit_bytes=int(vmem_limit),
        ),
    )(label2d, pred)

    # Final reduction (tiny) in plain JAX: tree-style, keeps f32 precision.
    return jnp.sum(losses[:N, 0]) / jnp.float32(N)


class ClassifierCrossEntropyLossPallas:
    """Mirror of the PyTorch module; `weight` is stored but unused in forward."""

    def __init__(self, weight):
        self.weight = weight

    def __call__(self, inputs):
        pred = inputs["pred"]
        label = inputs["label"]
        return classifier_cross_entropy_loss(pred, label)


if __name__ == "__main__":
    key = jax.random.PRNGKey(0)
    k_pred, k_label, k_pred2, k_label2 = jax.random.split(key, 4)

    # --- small f32 check (matches the module's intended use) ---------------
    N, C = 16, 32
    pred = jax.random.normal(k_pred, (N, C), dtype=jnp.float32)
    label = jax.random.randint(k_label, (N,), 0, C, dtype=jnp.int32)

    module = ClassifierCrossEntropyLossPallas(weight=1.0)
    loss = module({"pred": pred, "label": label})
    loss = jax.block_until_ready(loss)

    lse = jax.nn.logsumexp(pred, axis=-1)
    picked = jnp.take_along_axis(pred, label[:, None], axis=-1)[:, 0]
    ref = jnp.mean(lse - picked)
    assert jnp.allclose(loss, ref, atol=1e-5, rtol=1e-5), (loss, ref)

    # --- bf16 logits + ragged N + non-multiple-of-128 C --------------------
    N2, C2 = 24, 130
    pred2 = jax.random.normal(k_pred2, (N2, C2), dtype=jnp.float32)
    label2 = jax.random.randint(k_label2, (N2,), 0, C2, dtype=jnp.int32)
    pred2_bf16 = pred2.astype(jnp.bfloat16)

    loss2 = classifier_cross_entropy_loss(pred2_bf16, label2)
    loss2 = jax.block_until_ready(loss2)

    p2 = pred2_bf16.astype(jnp.float32)
    lse2 = jax.nn.logsumexp(p2, axis=-1)
    picked2 = jnp.take_along_axis(p2, label2[:, None], axis=-1)[:, 0]
    ref2 = jnp.mean(lse2 - picked2)
    assert jnp.allclose(loss2, ref2, atol=1e-4, rtol=1e-4), (loss2, ref2)

    print("KERNEL_OK")
</pallas_src>

<mosaic_0001>
module attributes {stable_mosaic.version = 11 : i64} {
  func.func @_ce_kernel(%arg0: i32, %arg1: i32, %arg2: memref<16x1xi32, #tpu.memory_space<vmem>>, %arg3: memref<16x32xf32, #tpu.memory_space<vmem>>, %arg4: memref<16x1xf32, #tpu.memory_space<vmem>>, %arg5: memref<16x1xf32, #tpu.memory_space<vmem>>, %arg6: memref<16x1xf32, #tpu.memory_space<vmem>>, %arg7: memref<16x1xf32, #tpu.memory_space<vmem>>) attributes {dimension_semantics = [#tpu.dimension_semantics<parallel>, #tpu.dimension_semantics<arbitrary>], iteration_bounds = array<i64: 1, 1>, scalar_prefetch = 0 : i64, scratch_operands = 3 : i64, tpu.core_type = #tpu.core_type<tc>, window_params = [{transform_indices = @transform_0, window_bounds = array<i64: 16, 1>}, {transform_indices = @transform_1, window_bounds = array<i64: 16, 32>}, {transform_indices = @transform_2, window_bounds = array<i64: 16, 1>}]} {
    %c0_i32 = arith.constant 0 : i32
    %0 = arith.cmpi eq, %arg1, %c0_i32 : i32
    %1 = arith.extui %0 : i1 to i32
    %c0_i32_0 = arith.constant 0 : i32
    %2 = arith.cmpi ne, %1, %c0_i32_0 : i32
    scf.if %2 {
      %cst_21 = arith.constant 0xFF800000 : f32
      %37 = vector.broadcast %cst_21 : f32 to vector<16x1xf32>
      %c0_22 = arith.constant 0 : index
      %c0_23 = arith.constant 0 : index
      %38 = vector.load %arg5[%c0_22, %c0_23] : memref<16x1xf32, #tpu.memory_space<vmem>>, vector<16x1xf32>
      tpu.vector_store %arg5[%c0_22, %c0_23], %37 {strides = array<i32>} : memref<16x1xf32, #tpu.memory_space<vmem>>, vector<16x1xf32>,
      %cst_24 = arith.constant 0.000000e+00 : f32
      %39 = vector.broadcast %cst_24 : f32 to vector<16x1xf32>
      %c0_25 = arith.constant 0 : index
      %c0_26 = arith.constant 0 : index
      %40 = vector.load %arg6[%c0_25, %c0_26] : memref<16x1xf32, #tpu.memory_space<vmem>>, vector<16x1xf32>
      tpu.vector_store %arg6[%c0_25, %c0_26], %39 {strides = array<i32>} : memref<16x1xf32, #tpu.memory_space<vmem>>, vector<16x1xf32>,
      %cst_27 = arith.constant 0.000000e+00 : f32
      %41 = vector.broadcast %cst_27 : f32 to vector<16x1xf32>
      %c0_28 = arith.constant 0 : index
      %c0_29 = arith.constant 0 : index
      %42 = vector.load %arg7[%c0_28, %c0_29] : memref<16x1xf32, #tpu.memory_space<vmem>>, vector<16x1xf32>
      tpu.vector_store %arg7[%c0_28, %c0_29], %41 {strides = array<i32>} : memref<16x1xf32, #tpu.memory_space<vmem>>, vector<16x1xf32>,
    } else {
    }
    %c0 = arith.constant 0 : index
    %c0_1 = arith.constant 0 : index
    %3 = vector.load %arg3[%c0, %c0_1] : memref<16x32xf32, #tpu.memory_space<vmem>>, vector<16x32xf32>
    %c0_2 = arith.constant 0 : index
    %c0_3 = arith.constant 0 : index
    %4 = vector.load %arg2[%c0_2, %c0_3] : memref<16x1xi32, #tpu.memory_space<vmem>>, vector<16x1xi32>
    %5 = tpu.iota {dimensions = array<i32: 1>} : vector<16x32xi32>
    %c32_i32 = arith.constant 32 : i32
    %6 = arith.muli %arg1, %c32_i32 : i32
    %7 = vector.broadcast %6 : i32 to vector<16x32xi32>
    %8 = arith.addi %5, %7 : vector<16x32xi32>
    %c0_4 = arith.constant 0 : index
    %c0_5 = arith.constant 0 : index
    %9 = vector.load %arg7[%c0_4, %c0_5] : memref<16x1xf32, #tpu.memory_space<vmem>>, vector<16x1xf32>
    %10 = vector.broadcast %4 : vector<16x1xi32> to vector<16x32xi32>
    %11 = arith.cmpi eq, %8, %10 : vector<16x32xi32>
    %cst = arith.constant 0.000000e+00 : f32
    %12 = vector.broadcast %cst : f32 to vector<16x32xf32>
    %13 = arith.select %11, %3, %12 : vector<16x32xi1>, vector<16x32xf32>
    %cst_6 = arith.constant dense<0.000000e+00> : vector<16xf32>
    %14 = vector.multi_reduction <add>, %13, %cst_6 [1] : vector<16x32xf32> to vector<16xf32>
    %15 = vector.shape_cast %14 : vector<16xf32> to vector<16x1xf32>
    %16 = arith.addf %9, %15 : vector<16x1xf32>
    %c0_7 = arith.constant 0 : index
    %c0_8 = arith.constant 0 : index
    %17 = vector.load %arg7[%c0_7, %c0_8] : memref<16x1xf32, #tpu.memory_space<vmem>>, vector<16x1xf32>
    tpu.vector_store %arg7[%c0_7, %c0_8], %16 {strides = array<i32>} : memref<16x1xf32, #tpu.memory_space<vmem>>, vector<16x1xf32>,
    %c0_9 = arith.constant 0 : index
    %c0_10 = arith.constant 0 : index
    %18 = vector.load %arg5[%c0_9, %c0_10] : memref<16x1xf32, #tpu.memory_space<vmem>>, vector<16x1xf32>
    %cst_11 = arith.constant dense<0xFF800000> : vector<16xf32>
    %19 = vector.multi_reduction <maximumf>, %3, %cst_11 [1] : vector<16x32xf32> to vector<16xf32>
    %20 = vector.shape_cast %19 : vector<16xf32> to vector<16x1xf32>
    %21 = arith.maximumf %18, %20 : vector<16x1xf32>
    %c0_12 = arith.constant 0 : index
    %c0_13 = arith.constant 0 : index
    %22 = vector.load %arg6[%c0_12, %c0_13] : memref<16x1xf32, #tpu.memory_space<vmem>>, vector<16x1xf32>
    %23 = arith.subf %18, %21 : vector<16x1xf32>
    %24 = math.exp %23 : vector<16x1xf32>
    %25 = arith.mulf %22, %24 : vector<16x1xf32>
    %26 = vector.broadcast %21 : vector<16x1xf32> to vector<16x32xf32>
    %27 = arith.subf %3, %26 : vector<16x32xf32>
    %28 = math.exp %27 : vector<16x32xf32>
    %cst_14 = arith.constant dense<0.000000e+00> : vector<16xf32>
    %29 = vector.multi_reduction <add>, %28, %cst_14 [1] : vector<16x32xf32> to vector<16xf32>
    %30 = vector.shape_cast %29 : vector<16xf32> to vector<16x1xf32>
    %31 = arith.addf %25, %30 : vector<16x1xf32>
    %c0_15 = arith.constant 0 : index
    %c0_16 = arith.constant 0 : index
    %32 = vector.load %arg6[%c0_15, %c0_16] : memref<16x1xf32, #tpu.memory_space<vmem>>, vector<16x1xf32>
    tpu.vector_store %arg6[%c0_15, %c0_16], %31 {strides = array<i32>} : memref<16x1xf32, #tpu.memory_space<vmem>>, vector<16x1xf32>,
    %c0_17 = arith.constant 0 : index
    %c0_18 = arith.constant 0 : index
    %33 = vector.load %arg5[%c0_17, %c0_18] : memref<16x1xf32, #tpu.memory_space<vmem>>, vector<16x1xf32>
    tpu.vector_store %arg5[%c0_17, %c0_18], %21 {strides = array<i32>} : memref<16x1xf32, #tpu.memory_space<vmem>>, vector<16x1xf32>,
    %c0_i32_19 = arith.constant 0 : i32
    %34 = arith.cmpi eq, %arg1, %c0_i32_19 : i32
    %35 = arith.extui %34 : i1 to i32
    %c0_i32_20 = arith.constant 0 : i32
    %36 = arith.cmpi ne, %35, %c0_i32_20 : i32
    scf.if %36 {
      %c0_21 = arith.constant 0 : index
      %c0_22 = arith.constant 0 : index
      %37 = vector.load %arg5[%c0_21, %c0_22] : memref<16x1xf32, #tpu.memory_space<vmem>>, vector<16x1xf32>
      %c0_23 = arith.constant 0 : index
      %c0_24 = arith.constant 0 : index
      %38 = vector.load %arg6[%c0_23, %c0_24] : memref<16x1xf32, #tpu.memory_space<vmem>>, vector<16x1xf32>
      %39 = math.log %38 : vector<16x1xf32>
      %40 = arith.addf %37, %39 : vector<16x1xf32>
      %c0_25 = arith.constant 0 : index
      %c0_26 = arith.constant 0 : index
      %41 = vector.load %arg7[%c0_25, %c0_26] : memref<16x1xf32, #tpu.memory_space<vmem>>, vector<16x1xf32>
      %42 = arith.subf %40, %41 : vector<16x1xf32>
      %c0_27 = arith.constant 0 : index
      %c0_28 = arith.constant 0 : index
      %43 = vector.load %arg4[%c0_27, %c0_28] : memref<16x1xf32, #tpu.memory_space<vmem>>, vector<16x1xf32>
      tpu.vector_store %arg4[%c0_27, %c0_28], %42 {strides = array<i32>} : memref<16x1xf32, #tpu.memory_space<vmem>>, vector<16x1xf32>,
    } else {
    }
    return
  }
  func.func @transform_0(%arg0: i32, %arg1: i32) -> (i32, i32) {
    %c0_i32 = arith.constant 0 : i32
    %c0_i32_0 = arith.constant 0 : i32
    return %arg0, %c0_i32 : i32, i32
  }
  func.func @transform_1(%arg0: i32, %arg1: i32) -> (i32, i32) {
    %c0_i32 = arith.constant 0 : i32
    return %arg0, %arg1 : i32, i32
  }
  func.func @transform_2(%arg0: i32, %arg1: i32) -> (i32, i32) {
    %c0_i32 = arith.constant 0 : i32
    %c0_i32_0 = arith.constant 0 : i32
    return %arg0, %c0_i32 : i32, i32
  }
}

</mosaic_0001>

<bundles_post_ra>
// kernel: tpu_custom_call.1
= control target key start
LH: loop header
LB: loop body
LE: loop exit
PB: predicated region body
PF: predicated region fallthrough
CT: control target
= control target key end

     0   :  { %vm43_vm0 = vcmask 261120   ;;  %vm15_vm1 = vcmask 7168   ;;  %v143_v2 = vmov -inf   ;;  %v144_v5 = vmov 0   ;;  %s199_s1 = inlined_call_operand.vmem [shape: f32[16,32], index: 1, kind: input, shape index: {}]   ;;  %s200_s0 = inlined_call_operand.vmem [shape: s32[16,1], index: 0, kind: input, shape index: {}]   ;;  %s201_s2 = inlined_call_operand.vmem [shape: f32[16,1], index: 2, kind: output, shape index: {}]  }
   0x1   :  { %v22_v0 = vld [vmem:[%s199_s1] sm:$0xff]  ;;  %v23_v1 = vld [vmem:[%s199_s1 + $0x8] sm:$0xff]  ;;  %16 = vst.msk [vmem:[#allocation2] sm:$0xff] %vm15_vm1, %v143_v2  ;;  %17 = vst.msk [vmem:[#allocation2 + $0x8] sm:$0xff] %vm15_vm1, %v143_v2  ;;  %129 = vset.pattern.permute.xlu1 %v144_v5  ;;  %130 = vset.pattern.permute.xlu0 %v144_v5  ;;  %v145_v6 = vmov 0.0   ;;  %v26_v17 = vlaneseq }
   0x2   :  { %v57_v3 = vsel %vm43_vm0, %v22_v0, -inf  ;;  %v60_v4 = vsel %vm43_vm0, %v23_v1, -inf  ;;  %18 = vst.msk [vmem:[#allocation3] sm:$0xff] %vm15_vm1, %v145_v6  ;;  %19 = vst.msk [vmem:[#allocation3 + $0x8] sm:$0xff] %vm15_vm1, %v145_v6  ;;  %v24_v7 = vld [vmem:[%s200_s0] sm:$0xff]  ;;  %v25_v16 = vld [vmem:[%s200_s0 + $0x8] sm:$0xff] }
   0x3   :  { %58 = vmax.xlane.f32.xlu0 %v57_v3  ;;  %20 = vst.msk [vmem:[#allocation4] sm:$0xff] %vm15_vm1, %v145_v6  ;;  %21 = vst.msk [vmem:[#allocation4 + $0x8] sm:$0xff] %vm15_vm1, %v145_v6  ;;  %v27_v18 = vand.u32 127, %v26_v17 }
   0x7   :  { %61 = vmax.xlane.f32.xlu0 %v60_v4 }
   0x8   :  { %v55_v8 = vld [vmem:[#allocation2] sm:$0xff]  ;;  %v56_v11 = vld [vmem:[#allocation2 + $0x8] sm:$0xff] }
   0x9   :  { %v65_v41 = vld [vmem:[#allocation3] sm:$0xff]  ;;  %v66_v45 = vld [vmem:[#allocation3 + $0x8] sm:$0xff] }
   0xa   :  { %v31_v35 = vld [vmem:[#allocation4] sm:$0xff]  ;;  %v32_v50 = vld [vmem:[#allocation4 + $0x8] sm:$0xff] }
  0x1d   :  { %34 = vperm.xlu0 %130, %v24_v7  }
  0x90   :  { %v59_v9 = vpop.xlane.xlu0 %58 }
  0x91   :  { %v63_v10 = vmax.f32 %v55_v8, %v59_v9 }
  0x93   :  { %v67_v12 = vsub.f32 %v55_v8, %v63_v10  ;;  %101 = vst.msk [vmem:[#allocation2] sm:$0xff] %vm15_vm1, %v63_v10  ;;  %77 = vperm.xlu1 %129, %v63_v10  }
  0x94   :  { %v62_v13 = vpop.xlane.xlu0 %61 }
  0x95   :  { %v64_v14 = vmax.f32 %v56_v11, %v62_v13  ;;  %v69_v38 = vmul.f32 1.442695, %v67_v12 }
  0x97   :  { %v68_v15 = vsub.f32 %v56_v11, %v64_v14  ;;  %102 = vst.msk [vmem:[#allocation2 + $0x8] sm:$0xff] %vm15_vm1, %v64_v14  ;;  %82 = vperm.xlu1 %129, %v64_v14  }
  0x99   :  { %v71_v39 = vmul.f32 1.442695, %v68_v15 }
  0x9a   :  { %v106_v57 = vld [vmem:[#allocation2] sm:$0xff] }
  0x9b   :  { %37 = vperm.xlu1 %129, %v25_v16  }
  0x9c   :  { %v35_v19 = vpop.permute.xlu0 %34 }
  0x9d   :  { %vm39_vm2 = vcmp.eq.s32.totalorder %v27_v18, %v35_v19 }
  0x9e   :  { %v41_v20 = vsel %vm39_vm2, %v22_v0, 0.0  ;;  %v107_v63 = vld [vmem:[#allocation2 + $0x8] sm:$0xff] }
  0x9f   :  { %v44_v21 = vsel %vm43_vm0, %v41_v20, 0.0 }
  0xa0   :  { %45 = vadd.xlane.f32.xlu0 %v44_v21 }
 0x112   :  { %v78_v22 = vpop.permute.xlu1 %77 }
 0x113   :  { %v85_v23 = vsub.f32 %v22_v0, %v78_v22 }
 0x115   :  { %v87_v24 = vmul.f32 1.442695, %v85_v23 }
 0x116   :  { %v83_v25 = vpop.permute.xlu1 %82 }
 0x117   :  { %131 = vpow2.f32 %v87_v24  ;;  %v86_v26 = vsub.f32 %v23_v1, %v83_v25 }
 0x119   :  { %v89_v27 = vmul.f32 1.442695, %v86_v26 }
 0x11a   :  { %v38_v29 = vpop.permute.xlu1 %37 }
 0x11b   :  { %133 = vpow2.f32 %v89_v27  ;;  %vm40_vm3 = vcmp.eq.s32.totalorder %v27_v18, %v38_v29 }
 0x11c   :  { %v42_v33 = vsel %vm40_vm3, %v23_v1, 0.0  ;;  %135 = vpow2.f32 %v69_v38 }
 0x11d   :  { %v47_v34 = vsel %vm43_vm0, %v42_v33, 0.0  ;;  %137 = vpow2.f32 %v71_v39 }
 0x121   :  { %v132_v28 = vpop.eup %131 }
 0x122   :  { %v91_v30 = vsel %vm43_vm0, %v132_v28, 0.0 }
 0x123   :  { %92 = vadd.xlane.f32.xlu1 %v91_v30 }
 0x125   :  { %v134_v31 = vpop.eup %133 }
 0x126   :  { %v94_v32 = vsel %vm43_vm0, %v134_v31, 0.0  ;;  %v136_v40 = vpop.eup %135 }
 0x127   :  { %95 = vadd.xlane.f32.xlu1 %v94_v32  ;;  %v73_v42 = vmul.f32 %v136_v40, %v65_v41  ;;  %v138_v43 = vpop.eup %137 }
 0x128   :  { %v74_v47 = vmul.f32 %v138_v43, %v66_v45 }
 0x12b   :  { %48 = vadd.xlane.f32.xlu1 %v47_v34 }
 0x12d   :  { %v46_v36 = vpop.xlane.xlu0 %45 }
 0x12e   :  { %v50_v37 = vadd.f32 %v46_v36, %v31_v35 }
 0x130   :  { %53 = vst.msk [vmem:[#allocation4] sm:$0xff] %vm15_vm1, %v50_v37 }
 0x137   :  { %v116_v58 = vld [vmem:[#allocation4] sm:$0xff] }
 0x1b0   :  { %v93_v44 = vpop.xlane.xlu1 %92 }
 0x1b1   :  { %v97_v46 = vadd.f32 %v93_v44, %v73_v42 }
 0x1b3   :  { %99 = vst.msk [vmem:[#allocation3] sm:$0xff] %vm15_vm1, %v97_v46 }
 0x1b4   :  { %v96_v48 = vpop.xlane.xlu1 %95 }
 0x1b5   :  { %v98_v49 = vadd.f32 %v96_v48, %v74_v47 }
 0x1b7   :  { %100 = vst.msk [vmem:[#allocation3 + $0x8] sm:$0xff] %vm15_vm1, %v98_v49 }
 0x1b8   :  { %v49_v51 = vpop.xlane.xlu1 %48 }
 0x1b9   :  { %v51_v52 = vadd.f32 %v49_v51, %v32_v50 }
 0x1ba   :  { %v108_v53 = vld [vmem:[#allocation3] sm:$0xff] }
 0x1bb   :  { %139 = vlog2.f32 %v108_v53  ;;  %54 = vst.msk [vmem:[#allocation4 + $0x8] sm:$0xff] %vm15_vm1, %v51_v52 }
 0x1be   :  { %v109_v54 = vld [vmem:[#allocation3 + $0x8] sm:$0xff] }
 0x1bf   :  { %141 = vlog2.f32 %v109_v54 }
 0x1c2   :  { %v117_v1 = vld [vmem:[#allocation4 + $0x8] sm:$0xff] }
 0x1c5   :  { %v140_v55 = vpop.eup %139 }
 0x1c6   :  { %v111_v56 = vmul.f32 0.6931472, %v140_v55 }
 0x1c8   :  { %v114_v59 = vadd.f32 %v111_v56, %v106_v57 }
 0x1c9   :  { %v142_v60 = vpop.eup %141 }
 0x1ca   :  { %v113_v61 = vmul.f32 0.6931472, %v142_v60  ;;  %v118_v62 = vsub.f32 %v114_v59, %v116_v58 }
 0x1cc   :  { %v115_v0 = vadd.f32 %v113_v61, %v107_v63  ;;  %120 = vst.msk [vmem:[%s201_s2] sm:$0xff] %vm15_vm1, %v118_v62 }
 0x1ce   :  { %v119_v2 = vsub.f32 %v115_v0, %v117_v1 }
 0x1d0   :  { %121 = vst.msk [vmem:[%s201_s2 + $0x8] sm:$0xff] %vm15_vm1, %v119_v2 }

</bundles_post_ra>
